<compile_context>
chip_gen: v5e
topology: v5e:2x2
jax: 0.10.0
libtpu: 0.0.40
codegen_flags: <defaults>
</compile_context>

<pallas_src>
import functools

import jax
import jax.numpy as jnp
from jax.experimental import pallas as pl
from jax.experimental.pallas import tpu as pltpu

LANES = 128
TARGET_BLOCK_BYTES = 2 * 1024 * 1024     # per input, per block
VMEM_LIMIT_BYTES = 32 * 1024 * 1024      # safe on v5e/v6e/v7x
DEFAULT_EPS = 1e-8


def _round_up(a, b):
    return -(-a // b) * b


def _num_tensorcores():
    """2 on v7x (explicit megacore split), else 1 (grid is a serial loop)."""
    try:
        kind = jax.devices()[0].device_kind.lower()
    except Exception:
        return 1
    if ("v7" in kind or "tpu7" in kind) and hasattr(pltpu, "CORE_PARALLEL"):
        return 2
    return 1


def _wbce_kernel(x_ref, t_ref, w_ref, acc_ref, *, eps, red_axis):
    # Zero this core's resident accumulator slab on its first reduction step.
    @pl.when(pl.program_id(red_axis) == 0)
    def _init():
        acc_ref[...] = jnp.zeros_like(acc_ref)

    x = x_ref[...].astype(jnp.float32)                     # logits
    t = t_ref[...].astype(jnp.float32)                     # targets
    w = jnp.maximum(w_ref[...].astype(jnp.float32), eps)   # clamp(min=eps)

    # Numerically stable BCE with logits:
    #   loss = max(x, 0) - x*t + log1p(exp(-|x|))
    loss = jnp.maximum(x, 0.0) - x * t + jnp.log1p(jnp.exp(-jnp.abs(x)))

    is_pos = t == 1.0
    is_neg = t == 0.0
    # Padded tail elements carry sentinel target (-1) and weight 0, so they
    # fall into neither group and contribute exactly zero -- no mask needed.
    pos_w = jnp.where(is_pos, w, 0.0)
    neg_w = jnp.where(is_neg, w, 0.0)

    # Six per-lane partial sums packed into one (8,128) slab -> single
    # full-tile accumulator update.
    parts = jnp.concatenate([
        jnp.sum(pos_w * loss, axis=0, keepdims=True),    # pos weighted loss
        jnp.sum(pos_w, axis=0, keepdims=True),           # pos weight
        jnp.sum(neg_w * loss, axis=0, keepdims=True),    # neg weighted loss
        jnp.sum(neg_w, axis=0, keepdims=True),           # neg weight
        jnp.sum(is_pos.astype(jnp.float32), axis=0, keepdims=True),  # pos count
        jnp.sum(is_neg.astype(jnp.float32), axis=0, keepdims=True),  # neg count
        jnp.zeros((2, LANES), jnp.float32),              # pad to 8 sublanes
    ], axis=0)
    acc_ref[...] += parts


def weighted_balanced_bce_loss(output, target, weights, epsilon=DEFAULT_EPS):
    """Equivalent of WeightedNegativePositiveBalancedBCELoss.forward."""
    out_dtype = output.dtype

    def _prep(a):
        a = a.reshape(-1)
        if a.dtype != jnp.float32 and a.dtype != jnp.bfloat16:
            a = a.astype(jnp.float32)     # mimics torch .float() on int/bool
        return a

    x = _prep(output)
    t = _prep(target)
    w = _prep(weights)

    n = x.shape[0]
    if n == 0:
        return jnp.zeros((), out_dtype)

    itemsizes = [jnp.dtype(a.dtype).itemsize for a in (x, t, w)]
    # Native sublane tile of the narrowest dtype: f32 -> 8 rows, bf16 -> 16.
    row_tile = 8 if min(itemsizes) >= 4 else 16
    # Dtype-aware block cap: each input block moves ~TARGET_BLOCK_BYTES.
    cap_rows = max(row_tile,
                   (TARGET_BLOCK_BYTES // (LANES * max(itemsizes)))
                   // row_tile * row_tile)

    rows = -(-n // LANES)
    num_blocks = -(-rows // cap_rows)

    num_cores = _num_tensorcores()
    if num_cores > 1 and num_blocks > 1:
        num_blocks = _round_up(num_blocks, num_cores)
    else:
        num_cores = 1
    bpc = num_blocks // num_cores

    # Balanced blocks; pad to an exact multiple of the block so there are no
    # partial blocks, no phantom grid steps, and no stale-VMEM tails.
    block_rows = _round_up(-(-rows // num_blocks), row_tile)
    padded_rows = num_blocks * block_rows
    pad = padded_rows * LANES - n
    if pad:
        x = jnp.pad(x, (0, pad))                          # logit 0 (finite loss)
        t = jnp.pad(t, (0, pad), constant_values=-1.0)    # sentinel: not pos/neg
        w = jnp.pad(w, (0, pad))                          # weight 0

    x2 = x.reshape(padded_rows, LANES)
    t2 = t.reshape(padded_rows, LANES)
    w2 = w.reshape(padded_rows, LANES)

    if num_cores > 1:
        grid = (num_cores, bpc)
        in_map = lambda c, i: (c * bpc + i, 0)
        out_map = lambda c, i: (c, 0, 0)
        dim_sem = (pltpu.CORE_PARALLEL, pltpu.ARBITRARY)
    else:
        grid = (num_blocks,)
        in_map = lambda i: (i, 0)
        out_map = lambda i: (0, 0, 0)
        dim_sem = ("arbitrary",)

    in_spec = pl.BlockSpec((block_rows, LANES), in_map)
    kernel = functools.partial(_wbce_kernel, eps=float(epsilon),
                               red_axis=len(grid) - 1)

    acc = pl.pallas_call(
        kernel,
        out_shape=jax.ShapeDtypeStruct((num_cores, 8, LANES), jnp.float32),
        grid=grid,
        in_specs=[in_spec, in_spec, in_spec],
        out_specs=pl.BlockSpec((None, 8, LANES), out_map),
        compiler_params=pltpu.CompilerParams(
            dimension_semantics=dim_sem,
            vmem_limit_bytes=VMEM_LIMIT_BYTES),
    )(x2, t2, w2)

    sums = jnp.sum(acc, axis=(0, 2))                      # (8,) final reduction
    pos_wl, pos_wsum, neg_wl, neg_wsum, n_pos, n_neg = (sums[i] for i in range(6))

    pos_mean = pos_wl / jnp.maximum(pos_wsum, epsilon)
    neg_mean = neg_wl / jnp.maximum(neg_wsum, epsilon)
    has_pos = n_pos > 0
    has_neg = n_neg > 0
    # TODO(synk): PyTorch's data-dependent if/elif is realized as scalar
    # jnp.where glue (no clean in-kernel equivalent).
    loss = jnp.where(
        has_pos & has_neg,
        0.5 * (pos_mean + neg_mean),
        jnp.where(has_pos, pos_mean, jnp.where(has_neg, neg_mean, 0.0)),
    )
    return loss.astype(out_dtype)


def _reference_loss(output, target, weights, epsilon=DEFAULT_EPS):
    """Pure-JAX reference mirroring the PyTorch module."""
    x = output.reshape(-1).astype(jnp.float32)
    t = target.reshape(-1).astype(jnp.float32)
    w = jnp.maximum(weights.reshape(-1).astype(jnp.float32), epsilon)
    loss = jnp.maximum(x, 0.0) - x * t + jnp.log1p(jnp.exp(-jnp.abs(x)))
    pos = (t == 1.0).astype(jnp.float32)
    neg = (t == 0.0).astype(jnp.float32)
    n_pos = pos.sum()
    n_neg = neg.sum()
    pos_mean = (pos * w * loss).sum() / jnp.maximum((pos * w).sum(), epsilon)
    neg_mean = (neg * w * loss).sum() / jnp.maximum((neg * w).sum(), epsilon)
    out = jnp.where(
        (n_pos > 0) & (n_neg > 0), 0.5 * (pos_mean + neg_mean),
        jnp.where(n_pos > 0, pos_mean, jnp.where(n_neg > 0, neg_mean, 0.0)))
    return out.astype(output.dtype)


if __name__ == "__main__":
    key = jax.random.PRNGKey(0)
    k1, k2, k3 = jax.random.split(key, 3)

    # NCHW-style logits, lane-aligned size (no pad path).
    shape = (2, 4, 16, 16)
    logits = jax.random.normal(k1, shape, dtype=jnp.float32)
    target = (jax.random.uniform(k2, shape) > 0.5).astype(jnp.float32)
    weights = jax.random.uniform(k3, shape, minval=0.0, maxval=2.0,
                                 dtype=jnp.float32)

    loss = weighted_balanced_bce_loss(logits, target, weights)
    jax.block_until_ready(loss)
    ref = _reference_loss(logits, target, weights)
    assert jnp.allclose(loss, ref, rtol=1e-5, atol=1e-6), (loss, ref)

    # Odd size: exercises the sentinel-padded tail path.
    shape2 = (3, 5, 7)
    l2 = jax.random.normal(k1, shape2, dtype=jnp.float32)
    t2 = (jax.random.uniform(k2, shape2) > 0.3).astype(jnp.float32)
    w2 = jax.random.uniform(k3, shape2, minval=0.0, maxval=1.0,
                            dtype=jnp.float32)
    loss2 = weighted_balanced_bce_loss(l2, t2, w2)
    jax.block_until_ready(loss2)
    ref2 = _reference_loss(l2, t2, w2)
    assert jnp.allclose(loss2, ref2, rtol=1e-5, atol=1e-6), (loss2, ref2)

    print("KERNEL_OK")
</pallas_src>

<mosaic_0001>
module attributes {stable_mosaic.version = 11 : i64} {
  func.func @_wbce_kernel(%arg0: i32, %arg1: memref<16x128xf32, #tpu.memory_space<vmem>>, %arg2: memref<16x128xf32, #tpu.memory_space<vmem>>, %arg3: memref<16x128xf32, #tpu.memory_space<vmem>>, %arg4: memref<1x8x128xf32, #tpu.memory_space<vmem>>) attributes {dimension_semantics = [#tpu.dimension_semantics<arbitrary>], iteration_bounds = array<i64: 1>, scalar_prefetch = 0 : i64, scratch_operands = 0 : i64, tpu.core_type = #tpu.core_type<tc>, window_params = [{transform_indices = @transform_0, window_bounds = array<i64: 16, 128>}, {transform_indices = @transform_1, window_bounds = array<i64: 16, 128>}, {transform_indices = @transform_2, window_bounds = array<i64: 16, 128>}, {pipeline_mode = #tpu.pipeline_mode<synchronous>, transform_indices = @transform_3, window_bounds = array<i64: 1, 8, 128>}]} {
    %c0_i32 = arith.constant 0 : i32
    %0 = arith.cmpi eq, %arg0, %c0_i32 : i32
    %1 = arith.extui %0 : i1 to i32
    %c0_i32_0 = arith.constant 0 : i32
    %2 = arith.cmpi ne, %1, %c0_i32_0 : i32
    scf.if %2 {
      %cst_25 = arith.constant 0.000000e+00 : f32
      %52 = vector.broadcast %cst_25 : f32 to vector<8x128xf32>
      %c0_26 = arith.constant 0 : index
      %c0_27 = arith.constant 0 : index
      %c0_28 = arith.constant 0 : index
      %53 = vector.load %arg4[%c0_26, %c0_27, %c0_28] : memref<1x8x128xf32, #tpu.memory_space<vmem>>, vector<1x8x128xf32>
      %54 = vector.shape_cast %53 : vector<1x8x128xf32> to vector<8x128xf32>
      %55 = vector.shape_cast %52 : vector<8x128xf32> to vector<1x8x128xf32>
      tpu.vector_store %arg4[%c0_26, %c0_27, %c0_28], %55 {strides = array<i32>} : memref<1x8x128xf32, #tpu.memory_space<vmem>>, vector<1x8x128xf32>,
    } else {
    }
    %c0 = arith.constant 0 : index
    %c0_1 = arith.constant 0 : index
    %3 = vector.load %arg1[%c0, %c0_1] : memref<16x128xf32, #tpu.memory_space<vmem>>, vector<16x128xf32>
    %c0_2 = arith.constant 0 : index
    %c0_3 = arith.constant 0 : index
    %4 = vector.load %arg2[%c0_2, %c0_3] : memref<16x128xf32, #tpu.memory_space<vmem>>, vector<16x128xf32>
    %c0_4 = arith.constant 0 : index
    %c0_5 = arith.constant 0 : index
    %5 = vector.load %arg3[%c0_4, %c0_5] : memref<16x128xf32, #tpu.memory_space<vmem>>, vector<16x128xf32>
    %cst = arith.constant 9.99999993E-9 : f32
    %6 = vector.broadcast %cst : f32 to vector<16x128xf32>
    %7 = arith.maximumf %5, %6 : vector<16x128xf32>
    %cst_6 = arith.constant 0.000000e+00 : f32
    %8 = vector.broadcast %cst_6 : f32 to vector<16x128xf32>
    %9 = arith.maximumf %3, %8 : vector<16x128xf32>
    %10 = arith.mulf %3, %4 : vector<16x128xf32>
    %11 = arith.subf %9, %10 : vector<16x128xf32>
    %12 = math.absf %3 : vector<16x128xf32>
    %cst_7 = arith.constant 0.000000e+00 : f32
    %13 = vector.broadcast %cst_7 : f32 to vector<16x128xf32>
    %14 = arith.subf %13, %12 : vector<16x128xf32>
    %15 = math.exp %14 : vector<16x128xf32>
    %16 = math.log1p %15 : vector<16x128xf32>
    %17 = arith.addf %11, %16 : vector<16x128xf32>
    %cst_8 = arith.constant 1.000000e+00 : f32
    %18 = vector.broadcast %cst_8 : f32 to vector<16x128xf32>
    %19 = arith.cmpf oeq, %4, %18 : vector<16x128xf32>
    %cst_9 = arith.constant 0.000000e+00 : f32
    %20 = vector.broadcast %cst_9 : f32 to vector<16x128xf32>
    %21 = arith.cmpf oeq, %4, %20 : vector<16x128xf32>
    %cst_10 = arith.constant 0.000000e+00 : f32
    %22 = vector.broadcast %cst_10 : f32 to vector<16x128xf32>
    %23 = arith.select %19, %7, %22 : vector<16x128xi1>, vector<16x128xf32>
    %cst_11 = arith.constant 0.000000e+00 : f32
    %24 = vector.broadcast %cst_11 : f32 to vector<16x128xf32>
    %25 = arith.select %21, %7, %24 : vector<16x128xi1>, vector<16x128xf32>
    %26 = arith.mulf %23, %17 : vector<16x128xf32>
    %cst_12 = arith.constant dense<0.000000e+00> : vector<128xf32>
    %27 = vector.multi_reduction <add>, %26, %cst_12 [0] : vector<16x128xf32> to vector<128xf32>
    %28 = vector.shape_cast %27 : vector<128xf32> to vector<1x128xf32>
    %cst_13 = arith.constant dense<0.000000e+00> : vector<128xf32>
    %29 = vector.multi_reduction <add>, %23, %cst_13 [0] : vector<16x128xf32> to vector<128xf32>
    %30 = vector.shape_cast %29 : vector<128xf32> to vector<1x128xf32>
    %31 = arith.mulf %25, %17 : vector<16x128xf32>
    %cst_14 = arith.constant dense<0.000000e+00> : vector<128xf32>
    %32 = vector.multi_reduction <add>, %31, %cst_14 [0] : vector<16x128xf32> to vector<128xf32>
    %33 = vector.shape_cast %32 : vector<128xf32> to vector<1x128xf32>
    %cst_15 = arith.constant dense<0.000000e+00> : vector<128xf32>
    %34 = vector.multi_reduction <add>, %25, %cst_15 [0] : vector<16x128xf32> to vector<128xf32>
    %35 = vector.shape_cast %34 : vector<128xf32> to vector<1x128xf32>
    %36 = arith.extui %19 : vector<16x128xi1> to vector<16x128xi32>
    %37 = arith.sitofp %36 : vector<16x128xi32> to vector<16x128xf32>
    %cst_16 = arith.constant dense<0.000000e+00> : vector<128xf32>
    %38 = vector.multi_reduction <add>, %37, %cst_16 [0] : vector<16x128xf32> to vector<128xf32>
    %39 = vector.shape_cast %38 : vector<128xf32> to vector<1x128xf32>
    %40 = arith.extui %21 : vector<16x128xi1> to vector<16x128xi32>
    %41 = arith.sitofp %40 : vector<16x128xi32> to vector<16x128xf32>
    %cst_17 = arith.constant dense<0.000000e+00> : vector<128xf32>
    %42 = vector.multi_reduction <add>, %41, %cst_17 [0] : vector<16x128xf32> to vector<128xf32>
    %43 = vector.shape_cast %42 : vector<128xf32> to vector<1x128xf32>
    %cst_18 = arith.constant 0.000000e+00 : f32
    %44 = vector.broadcast %cst_18 : f32 to vector<2x128xf32>
    %45 = tpu.concatenate %28, %30, %33, %35, %39, %43, %44 in 0 : vector<1x128xf32>, vector<1x128xf32>, vector<1x128xf32>, vector<1x128xf32>, vector<1x128xf32>, vector<1x128xf32>, vector<2x128xf32> -> vector<8x128xf32>
    %c0_19 = arith.constant 0 : index
    %c0_20 = arith.constant 0 : index
    %c0_21 = arith.constant 0 : index
    %46 = vector.load %arg4[%c0_19, %c0_20, %c0_21] : memref<1x8x128xf32, #tpu.memory_space<vmem>>, vector<1x8x128xf32>
    %47 = vector.shape_cast %46 : vector<1x8x128xf32> to vector<8x128xf32>
    %48 = arith.addf %47, %45 : vector<8x128xf32>
    %c0_22 = arith.constant 0 : index
    %c0_23 = arith.constant 0 : index
    %c0_24 = arith.constant 0 : index
    %49 = vector.load %arg4[%c0_22, %c0_23, %c0_24] : memref<1x8x128xf32, #tpu.memory_space<vmem>>, vector<1x8x128xf32>
    %50 = vector.shape_cast %49 : vector<1x8x128xf32> to vector<8x128xf32>
    %51 = vector.shape_cast %48 : vector<8x128xf32> to vector<1x8x128xf32>
    tpu.vector_store %arg4[%c0_22, %c0_23, %c0_24], %51 {strides = array<i32>} : memref<1x8x128xf32, #tpu.memory_space<vmem>>, vector<1x8x128xf32>,
    return
  }
  func.func @transform_0(%arg0: i32) -> (i32, i32) {
    %c0_i32 = arith.constant 0 : i32
    %c0_i32_0 = arith.constant 0 : i32
    return %arg0, %c0_i32 : i32, i32
  }
  func.func @transform_1(%arg0: i32) -> (i32, i32) {
    %c0_i32 = arith.constant 0 : i32
    %c0_i32_0 = arith.constant 0 : i32
    return %arg0, %c0_i32 : i32, i32
  }
  func.func @transform_2(%arg0: i32) -> (i32, i32) {
    %c0_i32 = arith.constant 0 : i32
    %c0_i32_0 = arith.constant 0 : i32
    return %arg0, %c0_i32 : i32, i32
  }
  func.func @transform_3(%arg0: i32) -> (i32, i32, i32) {
    %c0_i32 = arith.constant 0 : i32
    %c0_i32_0 = arith.constant 0 : i32
    %c0_i32_1 = arith.constant 0 : i32
    %c0_i32_2 = arith.constant 0 : i32
    return %c0_i32, %c0_i32_0, %c0_i32_1 : i32, i32, i32
  }
}

</mosaic_0001>

<bundles_post_ra>
// kernel: tpu_custom_call.1
= control target key start
LH: loop header
LB: loop body
LE: loop exit
PB: predicated region body
PF: predicated region fallthrough
CT: control target
= control target key end

     0   :  { %8 = vsyncpa [#allocation3], 0  ;;  %s372_s0 = inlined_call_operand.hbm [shape: f32[16,128], index: 0, kind: input, shape index: {}]   ;;  %s373_s1 = inlined_call_operand.hbm [shape: f32[16,128], index: 1, kind: input, shape index: {}]   ;;  %s374_s2 = inlined_call_operand.hbm [shape: f32[16,128], index: 2, kind: input, shape index: {}]   ;;  %s375_s3 = inlined_call_operand.hbm [shape: f32[1,8,128], index: 3, kind: output, shape index: {}]  }
   0x1   :  { %9 = vsyncpa [#allocation6], 0 }
   0x2   :  { %10 = vsyncpa [#allocation4], 0  ;;  %s28_s14 = sshll.u32 %s373_s1, 4  ;;  %s325_s15 = smov [#allocation5]   ;;  %s29_s14 = int_to_ptr.hbm [resolvable:$true] %s28_s14 }
   0x3   :  { %s30_s16 = sshll.u32 %s325_s15, 4  ;;  %s15_s19 = sshll.u32 %s372_s0, 4  ;;  %s31_s16 = int_to_ptr.vmem [resolvable:$true] %s30_s16  ;;  %s16_s19 = int_to_ptr.hbm [resolvable:$true] %s15_s19 }
   0x4   :  { %s326_s20 = smov 128   ;;  %s327_s21 = smov 8  }
   0x5   :  { %36 = dma.hbm_to_vmem [thread:$0]  %s29_s14, 256, %s31_s16, [#allocation6], %s326_s20, %s326_s20, %s327_s21  }
   0x6   :  { %s328_s22 = smov [#allocation2]   ;;  %s41_s26 = sshll.u32 %s374_s2, 4  ;;  %s42_s26 = int_to_ptr.hbm [resolvable:$true] %s41_s26 }
   0x7   :  { %s17_s23 = sshll.u32 %s328_s22, 4  ;;  %s329_s1 = smov [#allocation7]   ;;  %s18_s23 = int_to_ptr.vmem [resolvable:$true] %s17_s23 }
   0x8   :  { %23 = dma.hbm_to_vmem [thread:$0]  %s16_s19, 256, %s18_s23, [#allocation3], %s326_s20, %s326_s20, %s327_s21  }
   0x9   :  { %s43_s27 = sshll.u32 %s329_s1, 4  ;;  %s44_s27 = int_to_ptr.vmem [resolvable:$true] %s43_s27 }
   0xa   :  { %49 = dma.hbm_to_vmem [thread:$0]  %s42_s26, 256, %s44_s27, [#allocation6], %s326_s20, %s326_s20, %s327_s21  }
   0xb   :  { %319 = dma.done.wait [#allocation3], 256  }
   0xc   :  { %320 = vsyncadd [#allocation3], 4294967040 }
   0xd   :  { %321 = dma.done.wait [#allocation6], 512  }
   0xe   :  { %322 = vsyncadd [#allocation6], 4294966784  ;;  %v67_v0 = vld [vmem:[#allocation2] sm:$0xff]  ;;  %v68_v1 = vld [vmem:[#allocation2 + $0x8] sm:$0xff]  ;;  %v330_v28 = vmov 0.0   ;;  %vm171_vm6 = vcmask 1040384  }
   0xf   :  { %v81_v2 = vand.u32 2147483647, %v67_v0  ;;  %v82_v3 = vand.u32 2147483647, %v68_v1  ;;  %v71_v8 = vld [vmem:[#allocation7] sm:$0xff]  ;;  %v72_v9 = vld [vmem:[#allocation7 + $0x8] sm:$0xff] }
  0x10   :  { %v69_v10 = vld [vmem:[#allocation5] sm:$0xff]  ;;  %v70_v11 = vld [vmem:[#allocation5 + $0x8] sm:$0xff]  ;;  %v73_v12 = vmax.f32 %v71_v8, 1e-08  ;;  %v74_v13 = vmax.f32 %v72_v9, 1e-08 }
  0x11   :  { %v83_v4 = vsub.f32 0.0, %v81_v2  ;;  %v84_v5 = vsub.f32 0.0, %v82_v3  ;;  %vm109_vm0 = vcmp.eq.f32.partialorder %v69_v10, 1.0  ;;  %vm110_vm1 = vcmp.eq.f32.partialorder %v70_v11, 1.0  ;;  %s331_s0 = smov [#allocation8]   ;;  %s193_s30 = sshll.u32 %s375_s3, 4  ;;  %s194_s30 = int_to_ptr.hbm [resolvable:$true] %s193_s30 }
  0x12   :  { %vm111_vm2 = vcmp.eq.f32.partialorder %v69_v10, 0.0  ;;  %vm112_vm3 = vcmp.eq.f32.partialorder %v70_v11, 0.0  ;;  %v75_v16 = vmax.f32 %v67_v0, 0.0  ;;  %v77_v17 = vmul.f32 %v69_v10, %v67_v0  ;;  %s191_s2 = sshll.u32 %s331_s0, 4  ;;  %s192_s2 = int_to_ptr.vmem [resolvable:$true] %s191_s2 }
  0x13   :  { %v85_v6 = vmul.f32 1.442695, %v83_v4  ;;  %v87_v7 = vmul.f32 1.442695, %v84_v5  ;;  %v113_v22 = vsel %vm109_vm0, %v73_v12, 0.0  ;;  %v114_v23 = vsel %vm110_vm1, %v74_v13, 0.0 }
  0x14   :  { %v115_v24 = vsel %vm111_vm2, %v73_v12, 0.0  ;;  %v116_v25 = vsel %vm112_vm3, %v74_v13, 0.0  ;;  %v126_v26 = vadd.f32 %v114_v23, %v113_v22  ;;  %v204_v29 = vsel %vm109_vm0, 1.0, %v330_v28 }
  0x15   :  { %215 = vpow2.f32 %v85_v6  ;;  %v205_v30 = vsel %vm110_vm1, 1.0, %v330_v28  ;;  %v206_v33 = vsel %vm111_vm2, 1.0, %v330_v28  ;;  %v207_v34 = vsel %vm112_vm3, 1.0, %v330_v28 }
  0x16   :  { %217 = vpow2.f32 %v87_v7  ;;  %v76_v35 = vmax.f32 %v68_v1, 0.0  ;;  %v78_v36 = vmul.f32 %v70_v11, %v68_v1  ;;  %v142_v38 = vadd.f32 %v116_v25, %v115_v24 }
  0x17   :  { %v153_v39 = vadd.f32 %v205_v30, %v204_v29  ;;  %v127_v41 = vrot.slane %v126_v26, 4  ;;  %v164_v42 = vadd.f32 %v207_v34, %v206_v33  ;;  %v79_v44 = vsub.f32 %v75_v16, %v77_v17 }
  0x18   :  { %v80_v47 = vsub.f32 %v76_v35, %v78_v36  ;;  %v143_v49 = vrot.slane %v142_v38, 4  ;;  %vm173_vm7 = vcmask 1041408   ;;  %vm175_vm8 = vcmask 1042432  }
  0x19   :  { %v154_v51 = vrot.slane %v153_v39, 4  ;;  %v128_v53 = vadd.f32 %v127_v41, %v126_v26  ;;  %v165_v54 = vrot.slane %v164_v42, 4  ;;  %vm177_vm9 = vcmask 1043456  }
  0x1a   :  { %v144_v58 = vadd.f32 %v143_v49, %v142_v38  ;;  %vm179_vm10 = vcmask 1044480   ;;  %vm181_vm11 = vcmask 1045504  }
  0x1b   :  { %v216_v14 = vpop.eup %215  ;;  %v155_v61 = vadd.f32 %v154_v51, %v153_v39  ;;  %v129_v63 = vrot.slane %v128_v53, 2  ;;  %v166_v1 = vadd.f32 %v165_v54, %v164_v42 }
  0x1c   :  { %v218_v15 = vpop.eup %217  ;;  %v89_v18 = vadd.f32 1.0, %v216_v14  ;;  %v92_v19 = vmul.f32 -0.5, %v216_v14  ;;  %v95_v31 = vand.u32 2147483647, %v216_v14  ;;  %v145_v4 = vrot.slane %v144_v58, 2 }
  0x1d   :  { %v98_v20 = vadd.f32 1.0, %v218_v15  ;;  %v101_v21 = vmul.f32 -0.5, %v218_v15  ;;  %v104_v37 = vand.u32 2147483647, %v218_v15  ;;  %v156_v5 = vrot.slane %v155_v61, 2 }
  0x1e   :  { %219 = vlog2.f32 %v89_v18  ;;  %v93_v27 = vadd.f32 1.0, %v92_v19  ;;  %vm96_vm4 = vcmp.lt.f32.partialorder %v95_v31, 0.0004427343  ;;  %v130_v7 = vadd.f32 %v129_v63, %v128_v53 }
  0x1f   :  { %221 = vlog2.f32 %v98_v20  ;;  %v102_v32 = vadd.f32 1.0, %v101_v21  ;;  %vm105_vm5 = vcmp.lt.f32.partialorder %v104_v37, 0.0004427343  ;;  %v167_v9 = vrot.slane %v166_v1, 2 }
  0x20   :  { %v94_v40 = vmul.f32 %v216_v14, %v93_v27  ;;  %v146_v12 = vadd.f32 %v145_v4, %v144_v58  ;;  %v157_v13 = vadd.f32 %v156_v5, %v155_v61 }
  0x21   :  { %v103_v45 = vmul.f32 %v218_v15, %v102_v32  ;;  %v131_v15 = vrot.slane %v130_v7, 1  ;;  %v168_v17 = vadd.f32 %v167_v9, %v166_v1 }
  0x22   :  { %v147_v20 = vrot.slane %v146_v12, 1  ;;  %v158_v21 = vrot.slane %v157_v13, 1 }
  0x24   :  { %v220_v43 = vpop.eup %219  ;;  %v148_v28 = vadd.f32 %v147_v20, %v146_v12  ;;  %v159_v29 = vadd.f32 %v158_v21, %v157_v13 }
  0x25   :  { %v222_v46 = vpop.eup %221  ;;  %v91_v48 = vmul.f32 0.6931472, %v220_v43 }
  0x26   :  { %v100_v50 = vmul.f32 0.6931472, %v222_v46 }
  0x27   :  { %v97_v52 = vsel %vm96_vm4, %v94_v40, %v91_v48 }
  0x28   :  { %v106_v55 = vsel %vm105_vm5, %v103_v45, %v100_v50  ;;  %v107_v56 = vadd.f32 %v97_v52, %v79_v44 }
  0x29   :  { %v108_v57 = vadd.f32 %v106_v55, %v80_v47 }
  0x2a   :  { %v117_v59 = vmul.f32 %v113_v22, %v107_v56  ;;  %v133_v60 = vmul.f32 %v115_v24, %v107_v56 }
  0x2b   :  { %v118_v62 = vmul.f32 %v114_v23, %v108_v57  ;;  %v134_v0 = vmul.f32 %v116_v25, %v108_v57  ;;  %v132_v23 = vadd.f32 %v131_v15, %v130_v7  ;;  %v169_v25 = vrot.slane %v168_v17, 1 }
  0x2d   :  { %v119_v2 = vadd.f32 %v118_v62, %v117_v59  ;;  %v135_v3 = vadd.f32 %v134_v0, %v133_v60  ;;  %v170_v30 = vadd.f32 %v169_v25, %v168_v17 }
  0x2f   :  { %v120_v6 = vrot.slane %v119_v2, 4  ;;  %v136_v8 = vrot.slane %v135_v3, 4 }
  0x31   :  { %v121_v10 = vadd.f32 %v120_v6, %v119_v2  ;;  %v137_v11 = vadd.f32 %v136_v8, %v135_v3 }
  0x33   :  { %v122_v14 = vrot.slane %v121_v10, 2  ;;  %v138_v16 = vrot.slane %v137_v11, 2 }
  0x35   :  { %v123_v18 = vadd.f32 %v122_v14, %v121_v10  ;;  %v139_v19 = vadd.f32 %v138_v16, %v137_v11 }
  0x37   :  { %v124_v22 = vrot.slane %v123_v18, 1  ;;  %v140_v24 = vrot.slane %v139_v19, 1 }
  0x39   :  { %v125_v26 = vadd.f32 %v124_v22, %v123_v18  ;;  %v141_v27 = vadd.f32 %v140_v24, %v139_v19 }
  0x3b   :  { %v172_v31 = vsel %vm171_vm6, %v125_v26, %v132_v23 }
  0x3c   :  { %v174_v32 = vsel %vm173_vm7, %v172_v31, %v141_v27 }
  0x3d   :  { %v176_v33 = vsel %vm175_vm8, %v174_v32, %v148_v28 }
  0x3e   :  { %v178_v34 = vsel %vm177_vm9, %v176_v33, %v159_v29 }
  0x3f   :  { %v180_v35 = vsel %vm179_vm10, %v178_v34, %v170_v30 }
  0x40   :  { %v182_v36 = vsel %vm181_vm11, %v180_v35, 0.0 }
  0x41   :  { %185 = vst [vmem:[#allocation8] sm:$0xff] %v182_v36 }
  0x42   :  { %196 = dma.vmem_to_hbm [thread:$0]  %s192_s2, 128, %s194_s30, [#allocation4]  }
  0x43   :  { %323 = dma.done.wait [#allocation4], 128  }
  0x44   :  { %324 = vsyncadd [#allocation4], 4294967168 }
  0x45   :  { %201 = vsyncpa [#allocation3], 1 }
  0x46   :  { %202 = vsyncpa [#allocation6], 1 }
  0x47   :  { %203 = vsyncpa [#allocation4], 1 }

</bundles_post_ra>
